<compile_context>
chip_gen: v7x
topology: tpu7x:2x2x1
jax: 0.10.0
libtpu: 0.0.40
codegen_flags: <defaults>
</compile_context>

<pallas_src>
import functools
import math

import jax
import jax.numpy as jnp
from jax import lax
from jax.experimental import pallas as pl
from jax.experimental.pallas import tpu as pltpu


def _round_up(x, m):
    return ((x + m - 1) // m) * m


def _choose_tile(n, cap=512):
    """Largest multiple of 8 <= cap that divides n (n is a multiple of 8)."""
    best = 8
    for cand in range(8, min(n, cap) + 1, 8):
        if n % cand == 0:
            best = cand
    return best


def _embed_encode_kernel(tok_ref, emb_ref, pe_ref, out_ref, *, scale, tile_t,
                         t_pad, vocab):
    """One (tile_t, E) output slab per grid step.

    tok_ref : (B*T_pad,) int32  token ids, SMEM (scalar prefetch)
    emb_ref : (V, E)     f32    full embedding table, VMEM-resident
                                (constant block index -> DMA'd from HBM once)
    pe_ref  : (tile_t, E) f32   PE rows for this tile (streamed per step)
    out_ref : (tile_t, E) f32
    """
    b = pl.program_id(0)
    t = pl.program_id(1)
    base = b * t_pad + t * tile_t

    def body(r, carry):
        tok = tok_ref[base + r]                 # scalar read from SMEM
        tok = jnp.clip(tok, 0, vocab - 1)       # guard padded ids (OOB-safe)
        row = emb_ref[pl.ds(tok, 1), :]         # (1, E) exact f32 gather, no MXU
        out_ref[pl.ds(r, 1), :] = row * scale + pe_ref[pl.ds(r, 1), :]
        return carry

    lax.fori_loop(0, tile_t, body, 0, unroll=(tile_t <= 64))


def embed_and_encode(tokens, embedding_table, pos_encodings):
    """Embedding gather + sqrt(E) scale + positional-encoding add."""
    B, T = tokens.shape
    V, E = embedding_table.shape
    assert T <= pos_encodings.shape[0], (
        "sentence length exceeds max_seq_len of the positional encodings")

    scale = float(math.sqrt(E))

    # Small-vocab path: the table is VMEM-resident (fetched once thanks to the
    # constant index_map).  Ceiling chosen so that even the pipeline's 2x
    # buffering of the resident block fits comfortably inside v7x's 64 MiB.
    table_bytes = V * E * 4
    assert table_bytes <= (12 << 20), (
        "embedding table too large for the VMEM-resident path")
    # TODO(synk): large-vocab path (table kept in HBM via memory_space=pl.ANY,
    # per-row gather DMAs driven by the scalar-prefetched ids) not implemented.

    # Pad T to a sublane multiple and pick a row tile that divides it.
    T_pad = _round_up(T, 8)
    tile_t = _choose_tile(T_pad)
    n_t = T_pad // tile_t

    tok_pad = jnp.pad(tokens.astype(jnp.int32), ((0, 0), (0, T_pad - T)))
    flat_tok = tok_pad.reshape(-1)                           # (B*T_pad,) -> SMEM

    pe_slab = pos_encodings[:T].astype(jnp.float32)
    pe_slab = jnp.pad(pe_slab, ((0, T_pad - T), (0, 0)))     # (T_pad, E)

    kernel = functools.partial(_embed_encode_kernel, scale=scale,
                               tile_t=tile_t, t_pad=T_pad, vocab=V)

    # VMEM budget: 2x resident table (pipeline buffers) + double-buffered
    # PE/output tiles + headroom; capped at 48 MiB so v7x (64 MiB) keeps slack.
    tile_bytes = tile_t * E * 4
    vmem_need = 2 * table_bytes + 4 * tile_bytes + (2 << 20)
    vmem_limit = int(min(max(vmem_need, 24 << 20), 48 << 20))

    # Memory-bound cost estimate (gather + VPU scale/add only).
    cost = pl.CostEstimate(
        flops=2 * B * T_pad * E,
        transcendentals=0,
        bytes_accessed=(table_bytes + B * T_pad * 4      # table (once) + ids
                        + B * T_pad * E * 4              # streamed PE reads
                        + B * T_pad * E * 4),            # output writes
    )

    out = pl.pallas_call(
        kernel,
        out_shape=jax.ShapeDtypeStruct((B * T_pad, E), jnp.float32),
        grid_spec=pltpu.PrefetchScalarGridSpec(
            num_scalar_prefetch=1,                       # token ids -> SMEM
            grid=(B, n_t),
            in_specs=[
                # full embedding table, VMEM-resident (constant block index)
                pl.BlockSpec((V, E), lambda b, t, tok: (0, 0)),
                # PE rows streamed per t-tile (no one-hot select)
                pl.BlockSpec((tile_t, E), lambda b, t, tok: (t, 0)),
            ],
            out_specs=pl.BlockSpec((tile_t, E),
                                   lambda b, t, tok: (b * n_t + t, 0)),
        ),
        compiler_params=pltpu.CompilerParams(
            # "arbitrary": avoid duplicating the resident table per TensorCore
            # on v7x; megacore sharding buys nothing for this HBM-bound op.
            dimension_semantics=("arbitrary", "arbitrary"),
            vmem_limit_bytes=vmem_limit,
        ),
        cost_estimate=cost,
    )(flat_tok, embedding_table.astype(jnp.float32), pe_slab)

    return out.reshape(B, T_pad, E)[:, :T, :]


def make_positional_encodings(max_seq_len, embedding_size, n_parameter):
    """PE[p, 2d] = sin(p / n^(2d/E)), PE[p, 2d+1] = cos(p / n^(2d/E))."""
    positions = jnp.arange(max_seq_len, dtype=jnp.float32)[:, None]
    dims = jnp.arange(embedding_size // 2, dtype=jnp.float32)[None, :]
    theta = positions / jnp.power(
        jnp.float32(n_parameter), 2.0 * dims / embedding_size)
    pe = jnp.zeros((max_seq_len, embedding_size), jnp.float32)
    pe = pe.at[:, 0::2].set(jnp.sin(theta))
    pe = pe.at[:, 1::2].set(jnp.cos(theta))
    return pe


def generate_mask(tokens, max_seq_len, pad_id=0):
    # TODO(synk): generate_mask is abstract in the PyTorch base class; this
    # concrete instantiation marks non-pad tokens True and pads to max_seq_len.
    B, T = tokens.shape
    valid = tokens != pad_id
    return jnp.pad(valid, ((0, 0), (0, max_seq_len - T)), constant_values=False)


def forward(tokens, embedding_table, pos_encodings, max_seq_len):
    """Mirror of EmbedderAndEncoderBase.forward: (encoded f32, mask bool)."""
    encoded = embed_and_encode(tokens, embedding_table, pos_encodings)
    mask = generate_mask(tokens, max_seq_len)
    return encoded.astype(jnp.float32), mask


if __name__ == "__main__":
    # Small, TPU-friendly shapes consistent with the module.
    dict_size = 64
    embedding_size = 128
    max_seq_len = 16
    n_parameter = 10000
    B, T = 2, 8

    key = jax.random.PRNGKey(0)
    k_emb, k_tok = jax.random.split(key)

    # nn.Embedding default init: N(0, 1)
    embedding_table = jax.random.normal(
        k_emb, (dict_size, embedding_size), dtype=jnp.float32)
    pos_encodings = make_positional_encodings(
        max_seq_len, embedding_size, n_parameter)
    tokens = jax.random.randint(
        k_tok, (B, T), minval=1, maxval=dict_size, dtype=jnp.int32)

    encoded, mask = forward(tokens, embedding_table, pos_encodings, max_seq_len)
    encoded, mask = jax.block_until_ready((encoded, mask))

    # Correctness check against a plain-JAX reference.
    ref = (jnp.take(embedding_table, tokens, axis=0)
           * math.sqrt(embedding_size)
           + pos_encodings[:T][None, :, :]).astype(jnp.float32)
    assert encoded.shape == (B, T, embedding_size)
    assert encoded.dtype == jnp.float32
    assert mask.shape == (B, max_seq_len) and mask.dtype == jnp.bool_
    assert jnp.allclose(encoded, ref, atol=1e-4, rtol=1e-5)

    print("KERNEL_OK")
</pallas_src>

<mosaic_0001>
module attributes {stable_mosaic.version = 11 : i64} {
  func.func @_embed_encode_kernel(%arg0: i32, %arg1: i32, %arg2: memref<16xi32, #tpu.memory_space<smem>>, %arg3: memref<64x128xf32, #tpu.memory_space<vmem>>, %arg4: memref<8x128xf32, #tpu.memory_space<vmem>>, %arg5: memref<8x128xf32, #tpu.memory_space<vmem>>) attributes {dimension_semantics = [#tpu.dimension_semantics<arbitrary>, #tpu.dimension_semantics<arbitrary>], iteration_bounds = array<i64: 2, 1>, scalar_prefetch = 1 : i64, scratch_operands = 0 : i64, tpu.core_type = #tpu.core_type<tc>, window_params = [{pipeline_mode = #tpu.pipeline_mode<synchronous>, transform_indices = @transform_0, window_bounds = array<i64: 64, 128>}, {transform_indices = @transform_1, window_bounds = array<i64: 8, 128>}, {transform_indices = @transform_2, window_bounds = array<i64: 8, 128>}]} {
    %c8_i32 = arith.constant 8 : i32
    %0 = arith.muli %arg0, %c8_i32 : i32
    %c8_i32_0 = arith.constant 8 : i32
    %1 = arith.muli %arg1, %c8_i32_0 : i32
    %2 = arith.addi %0, %1 : i32
    %c0_i32 = arith.constant 0 : i32
    %3 = arith.addi %2, %c0_i32 : i32
    %4 = arith.index_cast %3 : i32 to index
    %5 = memref.load %arg2[%4] : memref<16xi32, #tpu.memory_space<smem>>
    %c0_i32_1 = arith.constant 0 : i32
    %c63_i32 = arith.constant 63 : i32
    %6 = arith.maxsi %c0_i32_1, %5 : i32
    %7 = arith.minsi %c63_i32, %6 : i32
    %8 = arith.index_cast %7 : i32 to index
    %c0 = arith.constant 0 : index
    %9 = vector.load %arg3[%8, %c0] : memref<64x128xf32, #tpu.memory_space<vmem>>, vector<1x128xf32>
    %cst = arith.constant 11.3137083 : f32
    %10 = vector.broadcast %cst : f32 to vector<1x128xf32>
    %11 = arith.mulf %9, %10 : vector<1x128xf32>
    %12 = arith.index_cast %c0_i32 : i32 to index
    %c0_2 = arith.constant 0 : index
    %13 = vector.load %arg4[%12, %c0_2] : memref<8x128xf32, #tpu.memory_space<vmem>>, vector<1x128xf32>
    %14 = arith.addf %11, %13 : vector<1x128xf32>
    %15 = arith.index_cast %c0_i32 : i32 to index
    %c0_3 = arith.constant 0 : index
    %16 = vector.load %arg5[%15, %c0_3] : memref<8x128xf32, #tpu.memory_space<vmem>>, vector<1x128xf32>
    tpu.vector_store %arg5[%15, %c0_3], %14 {strides = array<i32>} : memref<8x128xf32, #tpu.memory_space<vmem>>, vector<1x128xf32>,
    %c1_i32 = arith.constant 1 : i32
    %17 = arith.addi %2, %c1_i32 : i32
    %18 = arith.index_cast %17 : i32 to index
    %19 = memref.load %arg2[%18] : memref<16xi32, #tpu.memory_space<smem>>
    %c0_i32_4 = arith.constant 0 : i32
    %c63_i32_5 = arith.constant 63 : i32
    %20 = arith.maxsi %c0_i32_4, %19 : i32
    %21 = arith.minsi %c63_i32_5, %20 : i32
    %22 = arith.index_cast %21 : i32 to index
    %c0_6 = arith.constant 0 : index
    %23 = vector.load %arg3[%22, %c0_6] : memref<64x128xf32, #tpu.memory_space<vmem>>, vector<1x128xf32>
    %cst_7 = arith.constant 11.3137083 : f32
    %24 = vector.broadcast %cst_7 : f32 to vector<1x128xf32>
    %25 = arith.mulf %23, %24 : vector<1x128xf32>
    %26 = arith.index_cast %c1_i32 : i32 to index
    %c0_8 = arith.constant 0 : index
    %27 = vector.load %arg4[%26, %c0_8] : memref<8x128xf32, #tpu.memory_space<vmem>>, vector<1x128xf32>
    %28 = arith.addf %25, %27 : vector<1x128xf32>
    %29 = arith.index_cast %c1_i32 : i32 to index
    %c0_9 = arith.constant 0 : index
    %30 = vector.load %arg5[%29, %c0_9] : memref<8x128xf32, #tpu.memory_space<vmem>>, vector<1x128xf32>
    tpu.vector_store %arg5[%29, %c0_9], %28 {strides = array<i32>} : memref<8x128xf32, #tpu.memory_space<vmem>>, vector<1x128xf32>,
    %c2_i32 = arith.constant 2 : i32
    %31 = arith.addi %2, %c2_i32 : i32
    %32 = arith.index_cast %31 : i32 to index
    %33 = memref.load %arg2[%32] : memref<16xi32, #tpu.memory_space<smem>>
    %c0_i32_10 = arith.constant 0 : i32
    %c63_i32_11 = arith.constant 63 : i32
    %34 = arith.maxsi %c0_i32_10, %33 : i32
    %35 = arith.minsi %c63_i32_11, %34 : i32
    %36 = arith.index_cast %35 : i32 to index
    %c0_12 = arith.constant 0 : index
    %37 = vector.load %arg3[%36, %c0_12] : memref<64x128xf32, #tpu.memory_space<vmem>>, vector<1x128xf32>
    %cst_13 = arith.constant 11.3137083 : f32
    %38 = vector.broadcast %cst_13 : f32 to vector<1x128xf32>
    %39 = arith.mulf %37, %38 : vector<1x128xf32>
    %40 = arith.index_cast %c2_i32 : i32 to index
    %c0_14 = arith.constant 0 : index
    %41 = vector.load %arg4[%40, %c0_14] : memref<8x128xf32, #tpu.memory_space<vmem>>, vector<1x128xf32>
    %42 = arith.addf %39, %41 : vector<1x128xf32>
    %43 = arith.index_cast %c2_i32 : i32 to index
    %c0_15 = arith.constant 0 : index
    %44 = vector.load %arg5[%43, %c0_15] : memref<8x128xf32, #tpu.memory_space<vmem>>, vector<1x128xf32>
    tpu.vector_store %arg5[%43, %c0_15], %42 {strides = array<i32>} : memref<8x128xf32, #tpu.memory_space<vmem>>, vector<1x128xf32>,
    %c3_i32 = arith.constant 3 : i32
    %45 = arith.addi %2, %c3_i32 : i32
    %46 = arith.index_cast %45 : i32 to index
    %47 = memref.load %arg2[%46] : memref<16xi32, #tpu.memory_space<smem>>
    %c0_i32_16 = arith.constant 0 : i32
    %c63_i32_17 = arith.constant 63 : i32
    %48 = arith.maxsi %c0_i32_16, %47 : i32
    %49 = arith.minsi %c63_i32_17, %48 : i32
    %50 = arith.index_cast %49 : i32 to index
    %c0_18 = arith.constant 0 : index
    %51 = vector.load %arg3[%50, %c0_18] : memref<64x128xf32, #tpu.memory_space<vmem>>, vector<1x128xf32>
    %cst_19 = arith.constant 11.3137083 : f32
    %52 = vector.broadcast %cst_19 : f32 to vector<1x128xf32>
    %53 = arith.mulf %51, %52 : vector<1x128xf32>
    %54 = arith.index_cast %c3_i32 : i32 to index
    %c0_20 = arith.constant 0 : index
    %55 = vector.load %arg4[%54, %c0_20] : memref<8x128xf32, #tpu.memory_space<vmem>>, vector<1x128xf32>
    %56 = arith.addf %53, %55 : vector<1x128xf32>
    %57 = arith.index_cast %c3_i32 : i32 to index
    %c0_21 = arith.constant 0 : index
    %58 = vector.load %arg5[%57, %c0_21] : memref<8x128xf32, #tpu.memory_space<vmem>>, vector<1x128xf32>
    tpu.vector_store %arg5[%57, %c0_21], %56 {strides = array<i32>} : memref<8x128xf32, #tpu.memory_space<vmem>>, vector<1x128xf32>,
    %c4_i32 = arith.constant 4 : i32
    %59 = arith.addi %2, %c4_i32 : i32
    %60 = arith.index_cast %59 : i32 to index
    %61 = memref.load %arg2[%60] : memref<16xi32, #tpu.memory_space<smem>>
    %c0_i32_22 = arith.constant 0 : i32
    %c63_i32_23 = arith.constant 63 : i32
    %62 = arith.maxsi %c0_i32_22, %61 : i32
    %63 = arith.minsi %c63_i32_23, %62 : i32
    %64 = arith.index_cast %63 : i32 to index
    %c0_24 = arith.constant 0 : index
    %65 = vector.load %arg3[%64, %c0_24] : memref<64x128xf32, #tpu.memory_space<vmem>>, vector<1x128xf32>
    %cst_25 = arith.constant 11.3137083 : f32
    %66 = vector.broadcast %cst_25 : f32 to vector<1x128xf32>
    %67 = arith.mulf %65, %66 : vector<1x128xf32>
    %68 = arith.index_cast %c4_i32 : i32 to index
    %c0_26 = arith.constant 0 : index
    %69 = vector.load %arg4[%68, %c0_26] : memref<8x128xf32, #tpu.memory_space<vmem>>, vector<1x128xf32>
    %70 = arith.addf %67, %69 : vector<1x128xf32>
    %71 = arith.index_cast %c4_i32 : i32 to index
    %c0_27 = arith.constant 0 : index
    %72 = vector.load %arg5[%71, %c0_27] : memref<8x128xf32, #tpu.memory_space<vmem>>, vector<1x128xf32>
    tpu.vector_store %arg5[%71, %c0_27], %70 {strides = array<i32>} : memref<8x128xf32, #tpu.memory_space<vmem>>, vector<1x128xf32>,
    %c5_i32 = arith.constant 5 : i32
    %73 = arith.addi %2, %c5_i32 : i32
    %74 = arith.index_cast %73 : i32 to index
    %75 = memref.load %arg2[%74] : memref<16xi32, #tpu.memory_space<smem>>
    %c0_i32_28 = arith.constant 0 : i32
    %c63_i32_29 = arith.constant 63 : i32
    %76 = arith.maxsi %c0_i32_28, %75 : i32
    %77 = arith.minsi %c63_i32_29, %76 : i32
    %78 = arith.index_cast %77 : i32 to index
    %c0_30 = arith.constant 0 : index
    %79 = vector.load %arg3[%78, %c0_30] : memref<64x128xf32, #tpu.memory_space<vmem>>, vector<1x128xf32>
    %cst_31 = arith.constant 11.3137083 : f32
    %80 = vector.broadcast %cst_31 : f32 to vector<1x128xf32>
    %81 = arith.mulf %79, %80 : vector<1x128xf32>
    %82 = arith.index_cast %c5_i32 : i32 to index
    %c0_32 = arith.constant 0 : index
    %83 = vector.load %arg4[%82, %c0_32] : memref<8x128xf32, #tpu.memory_space<vmem>>, vector<1x128xf32>
    %84 = arith.addf %81, %83 : vector<1x128xf32>
    %85 = arith.index_cast %c5_i32 : i32 to index
    %c0_33 = arith.constant 0 : index
    %86 = vector.load %arg5[%85, %c0_33] : memref<8x128xf32, #tpu.memory_space<vmem>>, vector<1x128xf32>
    tpu.vector_store %arg5[%85, %c0_33], %84 {strides = array<i32>} : memref<8x128xf32, #tpu.memory_space<vmem>>, vector<1x128xf32>,
    %c6_i32 = arith.constant 6 : i32
    %87 = arith.addi %2, %c6_i32 : i32
    %88 = arith.index_cast %87 : i32 to index
    %89 = memref.load %arg2[%88] : memref<16xi32, #tpu.memory_space<smem>>
    %c0_i32_34 = arith.constant 0 : i32
    %c63_i32_35 = arith.constant 63 : i32
    %90 = arith.maxsi %c0_i32_34, %89 : i32
    %91 = arith.minsi %c63_i32_35, %90 : i32
    %92 = arith.index_cast %91 : i32 to index
    %c0_36 = arith.constant 0 : index
    %93 = vector.load %arg3[%92, %c0_36] : memref<64x128xf32, #tpu.memory_space<vmem>>, vector<1x128xf32>
    %cst_37 = arith.constant 11.3137083 : f32
    %94 = vector.broadcast %cst_37 : f32 to vector<1x128xf32>
    %95 = arith.mulf %93, %94 : vector<1x128xf32>
    %96 = arith.index_cast %c6_i32 : i32 to index
    %c0_38 = arith.constant 0 : index
    %97 = vector.load %arg4[%96, %c0_38] : memref<8x128xf32, #tpu.memory_space<vmem>>, vector<1x128xf32>
    %98 = arith.addf %95, %97 : vector<1x128xf32>
    %99 = arith.index_cast %c6_i32 : i32 to index
    %c0_39 = arith.constant 0 : index
    %100 = vector.load %arg5[%99, %c0_39] : memref<8x128xf32, #tpu.memory_space<vmem>>, vector<1x128xf32>
    tpu.vector_store %arg5[%99, %c0_39], %98 {strides = array<i32>} : memref<8x128xf32, #tpu.memory_space<vmem>>, vector<1x128xf32>,
    %c7_i32 = arith.constant 7 : i32
    %101 = arith.addi %2, %c7_i32 : i32
    %102 = arith.index_cast %101 : i32 to index
    %103 = memref.load %arg2[%102] : memref<16xi32, #tpu.memory_space<smem>>
    %c0_i32_40 = arith.constant 0 : i32
    %c63_i32_41 = arith.constant 63 : i32
    %104 = arith.maxsi %c0_i32_40, %103 : i32
    %105 = arith.minsi %c63_i32_41, %104 : i32
    %106 = arith.index_cast %105 : i32 to index
    %c0_42 = arith.constant 0 : index
    %107 = vector.load %arg3[%106, %c0_42] : memref<64x128xf32, #tpu.memory_space<vmem>>, vector<1x128xf32>
    %cst_43 = arith.constant 11.3137083 : f32
    %108 = vector.broadcast %cst_43 : f32 to vector<1x128xf32>
    %109 = arith.mulf %107, %108 : vector<1x128xf32>
    %110 = arith.index_cast %c7_i32 : i32 to index
    %c0_44 = arith.constant 0 : index
    %111 = vector.load %arg4[%110, %c0_44] : memref<8x128xf32, #tpu.memory_space<vmem>>, vector<1x128xf32>
    %112 = arith.addf %109, %111 : vector<1x128xf32>
    %113 = arith.index_cast %c7_i32 : i32 to index
    %c0_45 = arith.constant 0 : index
    %114 = vector.load %arg5[%113, %c0_45] : memref<8x128xf32, #tpu.memory_space<vmem>>, vector<1x128xf32>
    tpu.vector_store %arg5[%113, %c0_45], %112 {strides = array<i32>} : memref<8x128xf32, #tpu.memory_space<vmem>>, vector<1x128xf32>,
    %c8_i32_46 = arith.constant 8 : i32
    return
  }
  func.func @transform_0(%arg0: i32, %arg1: i32, %arg2: memref<16xi32, #tpu.memory_space<smem>>) -> (i32, i32) {
    %c0_i32 = arith.constant 0 : i32
    %c0_i32_0 = arith.constant 0 : i32
    %c0_i32_1 = arith.constant 0 : i32
    return %c0_i32, %c0_i32_0 : i32, i32
  }
  func.func @transform_1(%arg0: i32, %arg1: i32, %arg2: memref<16xi32, #tpu.memory_space<smem>>) -> (i32, i32) {
    %c0_i32 = arith.constant 0 : i32
    %c0_i32_0 = arith.constant 0 : i32
    return %arg1, %c0_i32 : i32, i32
  }
  func.func @transform_2(%arg0: i32, %arg1: i32, %arg2: memref<16xi32, #tpu.memory_space<smem>>) -> (i32, i32) {
    %c1_i32 = arith.constant 1 : i32
    %0 = arith.muli %arg0, %c1_i32 : i32
    %1 = arith.addi %0, %arg1 : i32
    %c0_i32 = arith.constant 0 : i32
    %c0_i32_0 = arith.constant 0 : i32
    return %1, %c0_i32 : i32, i32
  }
}

</mosaic_0001>

<bundles_post_ra>
// kernel: tpu_custom_call.1
= control target key start
LH: loop header
LB: loop body
LE: loop exit
PB: predicated region body
PF: predicated region fallthrough
CT: control target
= control target key end

     0   :  { %s942_s0 = inlined_call_operand.hbm [shape: s32[16], index: 0, kind: input, shape index: {}]   ;;  %s943_s1 = inlined_call_operand.hbm [shape: f32[64,128], index: 1, kind: input, shape index: {}]   ;;  %s944_s2 = inlined_call_operand.hbm [shape: f32[8,128], index: 2, kind: input, shape index: {}]   ;;  %s945_s3 = inlined_call_operand.hbm [shape: f32[16,128], index: 3, kind: output, shape index: {}]  }
   0x1   :  { %s527_s14 = scalar_lea.hbm %s942_s0, 16 }
   0x2   :  { %p528_p0 = scmp.ne.s32.totalorder %s942_s0, %s527_s14  ;;  %p531_p1 = scmp.lt.u32.totalorder %s527_s14, %s942_s0 }
   0x4   :  { %p533_p2 = pnand %p531_p1, %p528_p0 }
   0x6   :  { %536 = shalt.err (!%p533_p2)  }
   0x7   :  { %s683_s19 = smov [#allocation3]  }
   0x8   :  { %9 = dma.hbm_to_smem %s942_s0, 16, %s683_s19, [#allocation2] }
   0x9   :  { %645 = dma.done.wait [#allocation2], 16 }
   0xa   :  { %646 = vsyncadd [#allocation2], 4294967280 }
   0xb   :  { %11 = sfence }
   0xc   :  { %12 = vsyncpa [#allocation5], 0 }
   0xd   :  { %13 = vsyncpa [#allocation8], 0 }
   0xe   :  { %14 = vsyncpa [#allocation6], 0 }
   0xf   :  { %16 = vsyncpa [#allocation6 + $0x1], 0  ;;  %s721_s22 = smov 0   ;;  %s723_s23 = smov 0  }
  0x10   :  { %s725_s24 = smov 0   ;;  %s727_s25 = smov 0  }
  0x11   :  { %s729_s26 = smov 0   ;;  %s731_s27 = smov 0  }
  0x12 LB: > { %s378_s0 = sadd.s32 4294967295, %s681_s27   ;;  %s379_s28 = sadd.s32 4294967294, %s681_s27   ;;  %s681_s27 = sphi %s731_s27, %s22_s27   ;;  %s677_s26 = sphi %s729_s26, %s963_s26   ;;  %s673_s25 = sphi %s727_s25, %s962_s25   ;;  %s669_s24 = sphi %s725_s24, %s961_s24   ;;  %s665_s23 = sphi %s723_s23, %s960_s23   ;;  %s661_s22 = sphi %s721_s22, %s959_s22  }
  0x13   : > { %s34_s29 = sadd.s32 1, %s677_s26  ;;  %s90_s30 = sadd.s32 1, %s669_s24 }
  0x14   : > { %p36_p3 = scmp.ge.s32.totalorder %s34_s29, 2  ;;  %p100_p4 = scmp.ne.s32.totalorder %s669_s24, %s665_s23 }
  0x15   : > { %p101_p5 = scmp.eq.s32.totalorder %s378_s0, 1  ;;  %p106_p6 = scmp.ne.s32.totalorder %s665_s23, %s661_s22 }
  0x16   : > { %s965_s29 = smov (%p36_p3, %s34_s29), 0  ;;  %p107_p8 = scmp.eq.s32.totalorder %s379_s28, 1 }
  0x17   : > { %p761_p7 = por %p101_p5, %p100_p4  ;;  %s87_s5 = ssub.s32 %s677_s26, %s965_s29 }
  0x18   : > { %p380_p9 = scmp.ge.s32.totalorder %s681_s27, 1  ;;  %p88_p10 = scmp.eq.s32.totalorder %s87_s5, 0 }
  0x19   : > { %s950_s4 = scalar_select %p761_p7, 1, 0 }
  0x1a   : > { %p768_p11 = por %p107_p8, %p106_p6  ;;  %p114_p12 = scmp.lt.s32.totalorder %s681_s27, 3 }
  0x1b   : > { %s774_s7 = scalar_select %p88_p10, %s669_s24, %s90_s30  }
  0x1c   : > { %s951_s6 = scalar_select %p768_p11, 1, 0 }
  0x1d   : > { %p776_p13 = pnand %p380_p9, %p114_p12  ;;  %p780_p0 = scmp.eq.s32.totalorder %s378_s0, 0 }
  0x1e   : > { %s684_s10 = smov [#allocation4]   ;;  %s685_s13 = smov [#allocation7]  }
  0x1f   : > { %s952_s8 = scalar_select %p776_p13, 1, 0 }
  0x20   : > { %s953_s9 = scalar_select %p780_p0, 1, 0 }
  0x21   : > { %p458_p1 = pneg %p776_p13  ;;  %s126_s11 = sshll.u32 %s684_s10, 4  ;;  %s127_s11 = int_to_ptr.vmem [resolvable:$true] %s126_s11 }
  0x22   : > { %s142_s14 = sshll.u32 %s685_s13, 4  ;;  %s537_s17 = scalar_lea.hbm %s943_s1, 1024  ;;  %s792_s14 = int_to_ptr.vmem [resolvable:$true] %s142_s14 }
  0x23   : > { %p788_p2 = pnand %p780_p0, %p458_p1  ;;  %p538_p3 = scmp.ne.s32.totalorder %s943_s1, %s537_s17 }
  0x24   : > { %p544_p8 = scmp.lt.u32.totalorder %s537_s17, %s943_s1 }
  0x25   : > { %p539_p4 = pneg %p788_p2 }
  0x27   : > { %p540_p5 = pnand %p539_p4, %p538_p3 }
  0x29   : > { %p541_p6 = pneg %p540_p5 }
  0x2b   : > { %p546_p9 = pnand %p544_p8, %p541_p6 }
  0x2d   : > { %549 = shalt.err (!%p546_p9)
}
  0x2e   : > { %s550_s0 = scalar_lea.vmem %s127_s11, 1024  ;;  %p558_p11 = scmp.lt.s32.totalorder %s127_s11, %s127_s11 }
  0x2f   : > { %p551_p10 = scmp.ne.s32.totalorder %s127_s11, %s550_s0  ;;  %p559_p7 = scmp.lt.s32.totalorder %s550_s0, %s550_s0 }
  0x31   : > { %p553_p12 = pnand %p551_p10, %p539_p4  ;;  %p560_p0 = por %p559_p7, %p558_p11 }
  0x33   : > { %p554_p1 = pneg %p553_p12 }
  0x35   : > { %p561_p13 = pnand %p560_p0, %p554_p1 }
  0x37   : > { %564 = shalt.err (!%p561_p13)
}
  0x38   : > { %s686_s28 = smov 128   ;;  %s687_s30 = smov 8  }
  0x39   : > { %461 = dma.hbm_to_vmem [thread:$0]  (!%p788_p2), %s943_s1, 1024, %s127_s11, [#allocation5], %s686_s28, %s686_s28, %s687_s30  }
  0x3a   : > { %s565_s16 = scalar_lea.hbm %s944_s2, 128 }
  0x3b   : > { %p566_p3 = scmp.ne.s32.totalorder %s944_s2, %s565_s16  ;;  %p572_p13 = scmp.lt.u32.totalorder %s565_s16, %s944_s2 }
  0x3d   : > { %p568_p7 = pnand %p566_p3, %p539_p4 }
  0x3f   : > { %p569_p11 = pneg %p568_p7 }
  0x41   : > { %p574_p0 = pnand %p572_p13, %p569_p11 }
  0x43   : > { %577 = shalt.err (!%p574_p0)
}
  0x44   : > { %s578_s11 = scalar_lea.vmem %s792_s14, 128  ;;  %p586_p9 = scmp.lt.s32.totalorder %s792_s14, %s792_s14 }
  0x45   : > { %p579_p5 = scmp.ne.s32.totalorder %s792_s14, %s578_s11  ;;  %p587_p10 = scmp.lt.s32.totalorder %s578_s11, %s578_s11 }
  0x47   : > { %p581_p6 = pnand %p579_p5, %p539_p4  ;;  %p588_p12 = por %p587_p10, %p586_p9 }
  0x49   : > { %p582_p8 = pneg %p581_p6 }
  0x4b   : > { %p589_p1 = pnand %p588_p12, %p582_p8 }
  0x4d   : > { %592 = shalt.err (!%p589_p1)
}
  0x4e   : > { %464 = dma.hbm_to_vmem [thread:$0]  (!%p788_p2), %s944_s2, 128, %s792_s14, [#allocation8]  }
  0x4f   : > { %p955_p3 = scmp.ne.s32.totalorder %s952_s8, 0 }
  0x50   : > { %p956_p7 = scmp.ne.s32.totalorder (!%p955_p3), %s953_s9, 0 }
  0x51   : > { %155 = sbr.rel (%p955_p3) target bundleno = 147 (0x93), region = 28 }
  0x58   : > { %648 = dma.done.wait (%p956_p7), [#allocation5], 1024  }
  0x59   : > { %650 = vsyncadd (%p956_p7), [#allocation5], 4294966272 }
  0x5a   : > { %652 = dma.done.wait (%p956_p7), [#allocation8], 128  }
  0x5b   : > { %654 = vsyncadd (%p956_p7), [#allocation8], 4294967168  ;;  %s173_s12 = sand.u32 1, %s665_s23   ;;  %s853_s14 = sshll.u32 %s673_s25, 3  ;;  %v188_v1 = vld [vmem:[#allocation7] sm:$0x1] }
  0x5c   : > { %s180_s8 = sld [smem:[#allocation3 + %s853_s14]]  ;;  %s858_s28 = sshll.u32 %s173_s12, 3  ;;  %v200_v5 = vld [vmem:[#allocation7 + $0x1] sm:$0x1]  ;;  %v212_v9 = vld [vmem:[#allocation7 + $0x2] sm:$0x1] }
  0x5d   : > { %s191_s30 = sadd.s32 1, %s853_s14  ;;  %s203_s5 = sadd.s32 2, %s853_s14  ;;  %v224_v13 = vld [vmem:[#allocation7 + $0x3] sm:$0x1]  ;;  %v236_v17 = vld [vmem:[#allocation7 + $0x4] sm:$0x1] }
  0x5e   : > { %s192_s10 = sld [smem:[#allocation3 + %s191_s30]]  ;;  %s215_s13 = sadd.s32 3, %s853_s14  ;;  %v248_v20 = vld [vmem:[#allocation7 + $0x5] sm:$0x1]  ;;  %v260_v22 = vld [vmem:[#allocation7 + $0x6] sm:$0x1] }
  0x5f   : > { %s204_s9 = sld [smem:[#allocation3 + %s203_s5]]  ;;  %s227_s15 = sadd.s32 4, %s853_s14  ;;  %v272_v29 = vld [vmem:[#allocation7 + $0x7] sm:$0x1] }
  0x60   : > { %s864_s16 = sld [smem:[#allocation3 + %s215_s13]]  ;;  %s871_s11 = scalar_lea.vmem [#allocation9], %s858_s28 }
  0x61   : > { %s866_s17 = sld [smem:[#allocation3 + %s227_s15]]  ;;  %s239_s28 = sadd.s32 5, %s853_s14 }
  0x62   : > { %p181_p2 = scmp.gt.s32.totalorder %s180_s8, 0  ;;  %p388_p4 = scmp.lt.s32.totalorder %s180_s8, 63 }
  0x63   : > { %s251_s30 = sadd.s32 6, %s853_s14  ;;  %s240_s5 = sld [smem:[#allocation3 + %s239_s28]] }
  0x64   : > { %s967_s8 = smov (!%p181_p2, %s180_s8), 0  ;;  %p193_p11 = scmp.gt.s32.totalorder %s192_s10, 0 }
  0x65   : > { %p393_p13 = scmp.lt.s32.totalorder %s192_s10, 63  ;;  %s969_s8 = smov (!%p388_p4, %s967_s8), 63 }
  0x66   : > { %s971_s10 = smov (!%p193_p11, %s192_s10), 0  ;;  %p205_p0 = scmp.gt.s32.totalorder %s204_s9, 0 }
  0x67   : > { %s185_s18 = scalar_lea.vmem [#allocation4], %s969_s8  ;;  %s973_s10 = smov (!%p393_p13, %s971_s10), 63 }
  0x68   : > { %v186_v0 = vld [vmem:[%s185_s18] sm:$0x1]  ;;  %s206_s19 = scalar_select %p205_p0, %s204_s9, 0 }
  0x69   : > { %v187_v2 = vmul.f32 11.313708, %v186_v0  ;;  %p398_p5 = scmp.lt.s32.totalorder %s204_s9, 63  ;;  %s197_s20 = scalar_lea.vmem [#allocation4], %s973_s10 }
  0x6a   : > { %v198_v4 = vld [vmem:[%s197_s20] sm:$0x1]  ;;  %p217_p6 = scmp.gt.s32.totalorder %s864_s16, 0  ;;  %p403_p8 = scmp.lt.s32.totalorder %s864_s16, 63 }
  0x6b   : > { %v189_v3 = vadd.f32 %v188_v1, %v187_v2  ;;  %v199_v6 = vmul.f32 11.313708, %v198_v4  ;;  %s975_s19 = smov (!%p398_p5, %s206_s19), 63  ;;  %p229_p9 = scmp.gt.s32.totalorder %s866_s17, 0 }
  0x6c   : > { %s977_s16 = smov (!%p217_p6, %s864_s16), 0  ;;  %s209_s21 = scalar_lea.vmem [#allocation4], %s975_s19 }
  0x6d   : > { %190 = vst [vmem:[%s871_s11] sm:$0x1] %v189_v3  ;;  %v201_v7 = vadd.f32 %v200_v5, %v199_v6  ;;  %v210_v8 = vld [vmem:[%s209_s21] sm:$0x1]  ;;  %s979_s16 = smov (!%p403_p8, %s977_s16), 63  ;;  %p408_p10 = scmp.lt.s32.totalorder %s866_s17, 63 }
  0x6e   : > { %v211_v10 = vmul.f32 11.313708, %v210_v8  ;;  %s230_s0 = scalar_select %p229_p9, %s866_s17, 0 }
  0x6f   : > { %202 = vst [vmem:[%s871_s11 + $0x1] sm:$0x1] %v201_v7  ;;  %s221_s8 = scalar_lea.vmem [#allocation4], %s979_s16  ;;  %s252_s10 = sld [smem:[#allocation3 + %s251_s30]] }
  0x70   : > { %v213_v11 = vadd.f32 %v212_v9, %v211_v10  ;;  %v222_v12 = vld [vmem:[%s221_s8] sm:$0x1]  ;;  %s981_s0 = smov (!%p408_p10, %s230_s0), 63  ;;  %s263_s9 = sadd.s32 7, %s853_s14 }
  0x71   : > { %v223_v14 = vmul.f32 11.313708, %v222_v12  ;;  %s233_s13 = scalar_lea.vmem [#allocation4], %s981_s0  ;;  %s264_s15 = sld [smem:[#allocation3 + %s263_s9]] }
  0x72   : > { %214 = vst [vmem:[%s871_s11 + $0x2] sm:$0x1] %v213_v11  ;;  %v234_v16 = vld [vmem:[%s233_s13] sm:$0x1]  ;;  %p241_p12 = scmp.gt.s32.totalorder %s240_s5, 0  ;;  %p413_p1 = scmp.lt.s32.totalorder %s240_s5, 63 }
  0x73   : > { %v225_v15 = vadd.f32 %v224_v13, %v223_v14  ;;  %v235_v18 = vmul.f32 11.313708, %v234_v16  ;;  %s429_s18 = sshll.u32 %s673_s25, 7  ;;  %s290_s19 = sshll.u32 %s871_s11, 4  ;;  %s894_s19 = int_to_ptr.vmem [resolvable:$true] %s290_s19 }
  0x74   : > { %s983_s5 = smov (!%p241_p12, %s240_s5), 0  ;;  %s892_s0 = scalar_lea.hbm %s945_s3, %s429_s18 }
  0x75   : > { %226 = vst [vmem:[%s871_s11 + $0x3] sm:$0x1] %v225_v15  ;;  %v237_v19 = vadd.f32 %v236_v17, %v235_v18  ;;  %p253_p3 = scmp.gt.s32.totalorder %s252_s10, 0  ;;  %p418_p7 = scmp.lt.s32.totalorder %s252_s10, 63 }
  0x76   : > { %s987_s5 = smov (!%p413_p1, %s983_s5), 63  ;;  %s276_s8 = scalar_lea.sflag [#allocation6], %s173_s12 }
  0x77   : > { %238 = vst [vmem:[%s871_s11 + $0x4] sm:$0x1] %v237_v19  ;;  %s985_s10 = smov (!%p253_p3, %s252_s10), 0  ;;  %p265_p2 = scmp.gt.s32.totalorder %s264_s15, 0 }
  0x78   : > { %s989_s10 = smov (!%p418_p7, %s985_s10), 63  ;;  %s245_s14 = scalar_lea.vmem [#allocation4], %s987_s5 }
  0x79   : > { %v246_v21 = vld [vmem:[%s245_s14] sm:$0x1]  ;;  %p423_p4 = scmp.lt.s32.totalorder %s264_s15, 63  ;;  %s257_s16 = scalar_lea.vmem [#allocation4], %s989_s10 }
  0x7a   : > { %v247_v23 = vmul.f32 11.313708, %v246_v21  ;;  %v258_v24 = vld [vmem:[%s257_s16] sm:$0x1]  ;;  %s991_s15 = smov (!%p265_p2, %s264_s15), 0  ;;  %s593_s28 = scalar_lea.vmem %s894_s19, 128 }
  0x7b   : > { %v259_v25 = vmul.f32 11.313708, %v258_v24  ;;  %s993_s15 = smov (!%p423_p4, %s991_s15), 63  ;;  %p594_p11 = scmp.ne.s32.totalorder %s894_s19, %s593_s28 }
  0x7c   : > { %v249_v26 = vadd.f32 %v248_v20, %v247_v23  ;;  %s269_s17 = scalar_lea.vmem [#allocation4], %s993_s15  ;;  %p957_p13 = scmp.ne.s32.totalorder %s950_s4, 0 }
  0x7d   : > { %v261_v27 = vadd.f32 %v260_v22, %v259_v25  ;;  %v270_v28 = vld [vmem:[%s269_s17] sm:$0x1]  ;;  %s688_s25 = smov [#allocation9]  }
  0x7e   : > { %250 = vst [vmem:[%s871_s11 + $0x5] sm:$0x1] %v249_v26  ;;  %v271_v30 = vmul.f32 11.313708, %v270_v28  ;;  %p595_p0 = pnand %p594_p11, %p957_p13  ;;  %s597_s30 = sshll.u32 %s688_s25, 4  ;;  %s598_s30 = int_to_ptr.vmem [resolvable:$false] %s597_s30 }
  0x7f   : > { %262 = vst [vmem:[%s871_s11 + $0x6] sm:$0x1] %v261_v27  ;;  %s599_s5 = scalar_lea.vmem %s598_s30, 256  ;;  %p600_p6 = scmp.lt.s32.totalorder %s894_s19, %s598_s30 }
  0x80   : > { %v273_v31 = vadd.f32 %v272_v29, %v271_v30  ;;  %p596_p5 = pneg %p595_p0  ;;  %p601_p8 = scmp.lt.s32.totalorder %s599_s5, %s593_s28 }
  0x82   : > { %274 = vst [vmem:[%s871_s11 + $0x7] sm:$0x1] %v273_v31  ;;  %p602_p9 = por %p601_p8, %p600_p6 }
  0x84   : > { %p603_p10 = pnand %p602_p9, %p596_p5 }
  0x86   : > { %606 = shalt.err (!%p603_p10)
}
  0x87   : > { %s607_s12 = scalar_lea.hbm %s892_s0, 128  ;;  %s611_s9 = scalar_lea.hbm %s945_s3, 256 }
  0x88   : > { %p608_p12 = scmp.ne.s32.totalorder %s892_s0, %s607_s12  ;;  %p612_p7 = scmp.lt.u32.totalorder %s892_s0, %s945_s3 }
  0x89   : > { %p613_p2 = scmp.lt.u32.totalorder %s611_s9, %s607_s12  ;;  %p615_p11 = scmp.lt.u32.totalorder %s607_s12, %s892_s0 }
  0x8a   : > { %p609_p1 = pnand %p608_p12, %p957_p13 }
  0x8b   : > { %p614_p4 = por %p613_p2, %p612_p7 }
  0x8c   : > { %p610_p3 = pneg %p609_p1 }
  0x8d   : > { %p616_p0 = por %p615_p11, %p614_p4 }
  0x8f   : > { %p617_p5 = pnand %p616_p0, %p610_p3 }
  0x91   : > { %620 = shalt.err (!%p617_p5)
}
  0x92   : > { %456 = dma.vmem_to_hbm [thread:$0]  (%p957_p13), %s894_s19, 128, %s892_s0, %s276_s8  }
  0x93 PF: > { %p473_p6 = scmp.ge.s32.totalorder %s681_s27, 2  ;;  %s302_s14 = sand.u32 1, %s661_s22  }
  0x94   : > { %p958_p8 = scmp.ne.s32.totalorder %s951_s6, 0  ;;  %s303_s16 = scalar_lea.sflag [#allocation6], %s302_s14 }
  0x96   : > { %p466_p9 = pnand %p473_p6, %p958_p8 }
  0x98   : > { %656 = dma.done.wait (!%p466_p9), %s303_s16, 128  }
  0x99   : > { %658 = vsyncadd (!%p466_p9), %s303_s16, 4294967168  ;;  %s22_s27 = sadd.s32 1, %s681_s27   ;;  %s959_s22 = smov %s665_s23 }
  0x9a   : > { %p19_p10 = scmp.ge.s32.totalorder %s22_s27, 4   ;;  %s960_s23 = smov %s669_s24 }
  0x9b   : > { %s961_s24 = smov %s774_s7  ;;  %s962_s25 = smov %s677_s26 }
  0x9c   : > { %s963_s26 = smov %s965_s29  ;;  %21 = sbr.rel (!%p19_p10) target bundleno = 18 (0x12), region = 78 }
  0xa3   :  { %308 = vsyncpa [#allocation5], 1 }
  0xa4   :  { %310 = vsyncpa [#allocation5 + $0x1], 1 }
  0xa5   :  { %311 = vsyncpa [#allocation8], 1 }
  0xa6   :  { %312 = vsyncpa [#allocation6], 1 }
  0xa7   :  { %314 = vsyncpa [#allocation6 + $0x1], 1 }

</bundles_post_ra>
